<compile_context>
chip_gen: v5e
topology: v5e:2x2
jax: 0.10.0
libtpu: 0.0.40
codegen_flags: <defaults>
</compile_context>

<pallas_src>
import math
import functools

import numpy as np
import jax
import jax.numpy as jnp
from jax import lax
from jax.experimental import pallas as pl
from jax.experimental.pallas import tpu as pltpu


def _round_up(a, b):
    return ((a + b - 1) // b) * b


def _cdiv(a, b):
    return -(-a // b)


def _vmem_budgets():
    """(scoped vmem limit, tile-sizing budget) per TPU generation."""
    cap = None
    try:
        cap = getattr(pltpu.get_tpu_info(), "vmem_capacity_bytes", None)
    except Exception:
        cap = None
    if cap is not None and cap >= 100 * 1024 * 1024:       # v5e / v6e: 128 MiB per TC
        return 96 * 1024 * 1024, 88 * 1024 * 1024
    # v7x (64 MiB per TC) or unknown -> conservative budget that works everywhere
    return 48 * 1024 * 1024, 40 * 1024 * 1024


# ----------------------------------------------------------------------------
# Tile sizing
# ----------------------------------------------------------------------------
def _fits_stage1(tv, B, D, M, wb, ob, budget):
    # double-buffered fused weight tile + bias tile + out tile, plus resident x
    need = 2 * (D * 2 * M * tv * wb + 2 * M * tv * 4 + B * tv * ob) + B * D * 4
    return need <= budget


def _pick_tile_v(req, B, D, M, V, wb, ob, budget):
    """Largest lane-aligned vocab tile fitting the budget; prefer an even tile count
    (v7x two-TensorCore sharding) and shrink to minimize vocab padding."""
    cap = _round_up(V, 128)
    tv = max(128, min(_round_up(req, 128), cap))
    while tv > 128 and not _fits_stage1(tv, B, D, M, wb, ob, budget):
        tv -= 128
    n = _cdiv(V, tv)
    if n % 2 and V > 128:
        n += 1
    tv = min(tv, _round_up(_cdiv(V, n), 128))
    return max(tv, 128)


def _fits_stage2_resident(tn, B, V_pad, wb, pb, budget):
    # double-buffered full-K gw slab + out tile + gamma/beta, plus resident probs
    need = 2 * (V_pad * tn * wb + B * tn * 4 + 2 * tn * 4) + B * V_pad * pb
    return need <= budget


def _pick_tile_n(req, B, V_pad, wb, pb, budget):
    """Output tile for the resident-K gating kernel, or None if even tn=128 does not
    fit (caller then uses the K-tiled accumulator fallback)."""
    tn = max(128, min(_round_up(req, 128), V_pad))
    best = None
    while tn >= 128:
        if V_pad % tn == 0 and _fits_stage2_resident(tn, B, V_pad, wb, pb, budget):
            if best is None:
                best = tn
            q = V_pad // tn
            if q % 2 == 0 or V_pad == 128:
                return tn
        tn -= 128
    return best


def _pick_tiles_ktiled(req, B, V_pad, wb, pb, budget):
    t = max(128, min(_round_up(req, 128), V_pad))
    while t > 128:
        need = 2 * (t * t * wb + B * t * pb + B * t * 4 + 2 * t * 4) + B * t * 4
        if V_pad % t == 0 and need <= budget:
            break
        t -= 128
    return t, t            # (tk, tn)


# ----------------------------------------------------------------------------
# Kernel 1: MoE probabilities per vocab tile.
#   probs[b, v] = sum_m softmax_batch(x @ Wg[m] + bg[m])[b, v]
#                       * sigmoid(x @ We[m] + be[m])[b, v]
# ----------------------------------------------------------------------------
def _moe_probs_kernel(x_ref, w_ref, b_ref, out_ref, *, num_mixtures, tile_v,
                      fuse_dot, approx_recip):
    M = num_mixtures
    x = x_ref[...].astype(w_ref.dtype)                                   # (B, D)
    b = b_ref[...]                                                       # (2M, TV) f32

    if fuse_dot:
        # One wide MXU dot for all gate+expert mixtures of this vocab tile.
        z = jnp.dot(x, w_ref[...], preferred_element_type=jnp.float32)   # (B, 2M*TV)

        def col(i):
            return z[:, i * tile_v:(i + 1) * tile_v]
    else:
        # Per-mixture dots over static lane-aligned slices keep the f32 live set
        # small when tile_v is large; w_ref is already VMEM-resident so HBM traffic
        # is unchanged.
        def col(i):
            return jnp.dot(x, w_ref[:, i * tile_v:(i + 1) * tile_v],
                           preferred_element_type=jnp.float32)

    acc = jnp.zeros(out_ref.shape, jnp.float32)                          # (B, TV)
    for m in range(M):
        g = col(m) + b[m:m + 1, :]
        # softmax over the BATCH axis (PyTorch nn.Softmax() implicit dim=0, 3-D input)
        g = g - jnp.max(g, axis=0, keepdims=True)
        eg = jnp.exp(g)
        gd = eg * pl.reciprocal(jnp.sum(eg, axis=0, keepdims=True), approx=approx_recip)
        e = col(M + m) + b[M + m:M + m + 1, :]
        acc = acc + gd * jax.nn.sigmoid(e)
    out_ref[...] = acc.astype(out_ref.dtype)


# ----------------------------------------------------------------------------
# Kernel 2a: gating, probs VMEM-resident (full-K gw slab streamed per output tile).
# ----------------------------------------------------------------------------
def _gating_kernel_resident(p_ref, w_ref, gamma_ref, beta_ref, out_ref, *, eps, tile_n):
    j = pl.program_id(0)
    p = p_ref[...]                                                       # (B, V_pad)
    z = jnp.dot(p, w_ref[...], preferred_element_type=jnp.float32)       # (B, TN)
    mean = jnp.mean(z, axis=0, keepdims=True)                            # training-mode BN
    var = jnp.mean((z - mean) ** 2, axis=0, keepdims=True)
    y = gamma_ref[...] * (z - mean) * lax.rsqrt(var + eps) + beta_ref[...]
    gates = jax.nn.sigmoid(y)
    start = pl.multiple_of(j * tile_n, 128)
    p_n = p_ref[:, pl.ds(start, tile_n)].astype(jnp.float32)
    out_ref[...] = (p_n * gates).astype(out_ref.dtype)


# ----------------------------------------------------------------------------
# Kernel 2b: gating, K-tiled accumulator fallback (huge vocab / tiny VMEM budget).
# ----------------------------------------------------------------------------
def _gating_kernel_ktiled(pk_ref, w_ref, pn_ref, gamma_ref, beta_ref, out_ref,
                          acc_ref, *, eps):
    k = pl.program_id(1)

    @pl.when(k == 0)
    def _():
        acc_ref[...] = jnp.zeros_like(acc_ref)

    acc_ref[...] += jnp.dot(pk_ref[...], w_ref[...], preferred_element_type=jnp.float32)

    @pl.when(k == pl.num_programs(1) - 1)
    def _():
        z = acc_ref[...]
        mean = jnp.mean(z, axis=0, keepdims=True)
        var = jnp.mean((z - mean) ** 2, axis=0, keepdims=True)
        y = gamma_ref[...] * (z - mean) * lax.rsqrt(var + eps) + beta_ref[...]
        gates = jax.nn.sigmoid(y)
        out_ref[...] = (pn_ref[...].astype(jnp.float32) * gates).astype(out_ref.dtype)


# ----------------------------------------------------------------------------
# One-time parameter packing (hoisted out of the forward pass).
# ----------------------------------------------------------------------------
def prepare_params(params, *, num_mixtures=2, batch_size=8, tile_v=2048, tile_n=2048,
                   weights_dtype=jnp.bfloat16, bn_eps=1e-5, approx_recip=True,
                   fuse_stage1_dot=None, force_ktiled_gating=False):
    wg, bg = params["wg"], params["bg"]          # (M+1, D, V), (M+1, V)
    we, be = params["we"], params["be"]          # (M,   D, V), (M,   V)
    gw, gamma, beta = params["gw"], params["gamma"], params["beta"]
    M = num_mixtures
    D = wg.shape[1]
    V = gw.shape[0]
    B = batch_size

    vmem_limit, budget = _vmem_budgets()
    wb = np.dtype(weights_dtype).itemsize
    pb = wb                                      # stage-1 probs are emitted in weights_dtype

    tv = _pick_tile_v(tile_v, B, D, M, V, wb, pb, budget)
    n_tiles = _cdiv(V, tv)
    V_pad = n_tiles * tv
    pad = V_pad - V

    # Drop the unused (M+1)-th gate slab; zero-pad the vocab axis so any vocab size
    # tiles cleanly (gw's zero padded ROWS keep padded probs columns inert).
    wg_m, bg_m = wg[:M], bg[:M]
    if pad:
        wg_m = jnp.pad(wg_m, ((0, 0), (0, 0), (0, pad)))
        bg_m = jnp.pad(bg_m, ((0, 0), (0, pad)))
        we = jnp.pad(we, ((0, 0), (0, 0), (0, pad)))
        be = jnp.pad(be, ((0, 0), (0, pad)))
        gw = jnp.pad(gw, ((0, pad), (0, pad)))
        gamma = jnp.pad(gamma, ((0, 0), (0, pad)))
        beta = jnp.pad(beta, ((0, 0), (0, pad)))

    # Grid-axis-leading fused layout: tile j holds the contiguous slab
    # [gate_0 .. gate_{M-1} | expert_0 .. expert_{M-1}] for that vocab tile, so each
    # stage-1 step is one fully contiguous HBM read.
    wstack = jnp.concatenate([wg_m, we], axis=0)                       # (2M, D, V_pad)
    wcat = (wstack.reshape(2 * M, D, n_tiles, tv)
            .transpose(2, 1, 0, 3)
            .reshape(n_tiles, D, 2 * M * tv)
            .astype(weights_dtype))
    bcat = jnp.concatenate([bg_m, be], axis=0).astype(jnp.float32)     # (2M, V_pad)

    tn = None if force_ktiled_gating else _pick_tile_n(tile_n, B, V_pad, wb, pb, budget)
    if tn is not None:
        # resident-K gating: gw repacked with the output-tile axis leading/contiguous
        n_out = V_pad // tn
        gw_pk = (gw.reshape(V_pad, n_out, tn).transpose(1, 0, 2)
                 .astype(weights_dtype))                               # (n_out, V_pad, tn)
        gate_cfg = dict(gating_mode="resident", tn=tn, tk=None)
    else:
        tk, tn_k = _pick_tiles_ktiled(tile_n, B, V_pad, wb, pb, budget)
        gw_pk = gw.astype(weights_dtype)                               # (V_pad, V_pad)
        gate_cfg = dict(gating_mode="ktiled", tn=tn_k, tk=tk)

    fuse = (2 * M * tv) <= 2048 if fuse_stage1_dot is None else bool(fuse_stage1_dot)
    cfg = dict(num_mixtures=M, input_size=D, vocab_size=V, V_pad=V_pad,
               tile_v=tv, n_tiles=n_tiles, fuse_dot=fuse, bn_eps=float(bn_eps),
               approx_recip=bool(approx_recip), vmem_limit=int(vmem_limit), **gate_cfg)
    return dict(wcat=wcat, bcat=bcat, gw=gw_pk,
                gamma=gamma.astype(jnp.float32), beta=beta.astype(jnp.float32),
                cfg=cfg)


# ----------------------------------------------------------------------------
# Forward pass (expects packed params from prepare_params).
# ----------------------------------------------------------------------------
def moe_model_forward(x, packed):
    cfg = packed["cfg"]
    M, D, V = cfg["num_mixtures"], cfg["input_size"], cfg["vocab_size"]
    V_pad, tv, n_tiles = cfg["V_pad"], cfg["tile_v"], cfg["n_tiles"]
    B = x.shape[0]
    wcat, bcat = packed["wcat"], packed["bcat"]
    probs_dtype = wcat.dtype
    wb = wcat.dtype.itemsize

    # -------- Stage 1: per-class MoE probabilities (B, V_pad) --------
    cost1 = pl.CostEstimate(
        flops=2 * B * D * 2 * M * V_pad,
        transcendentals=3 * M * B * V_pad,
        bytes_accessed=int(wcat.size * wb + bcat.size * 4 + B * D * 4 + B * V_pad * wb))
    probs = pl.pallas_call(
        functools.partial(_moe_probs_kernel, num_mixtures=M, tile_v=tv,
                          fuse_dot=cfg["fuse_dot"], approx_recip=cfg["approx_recip"]),
        out_shape=jax.ShapeDtypeStruct((B, V_pad), probs_dtype),
        grid_spec=pltpu.PrefetchScalarGridSpec(
            num_scalar_prefetch=0,
            grid=(n_tiles,),
            in_specs=[
                pl.BlockSpec((B, D), lambda j: (0, 0)),                          # x resident
                pl.BlockSpec((pl.Squeezed(), D, 2 * M * tv), lambda j: (j, 0, 0)),
                pl.BlockSpec((2 * M, tv), lambda j: (0, j)),
            ],
            out_specs=pl.BlockSpec((B, tv), lambda j: (0, j)),
        ),
        compiler_params=pltpu.CompilerParams(
            dimension_semantics=("parallel",),
            vmem_limit_bytes=cfg["vmem_limit"]),
        cost_estimate=cost1,
    )(x, wcat, bcat)

    # -------- Stage 2: gating matmul + BN + sigmoid + multiply --------
    gw, gamma, beta = packed["gw"], packed["gamma"], packed["beta"]
    eps = cfg["bn_eps"]
    if cfg["gating_mode"] == "resident":
        tn = cfg["tn"]
        cost2 = pl.CostEstimate(
            flops=2 * B * V_pad * V_pad,
            transcendentals=B * V_pad,
            bytes_accessed=int(gw.size * wb + B * V_pad * wb + B * V_pad * 4 + 2 * V_pad * 4))
        out = pl.pallas_call(
            functools.partial(_gating_kernel_resident, eps=eps, tile_n=tn),
            out_shape=jax.ShapeDtypeStruct((B, V_pad), jnp.float32),
            grid_spec=pltpu.PrefetchScalarGridSpec(
                num_scalar_prefetch=0,
                grid=(V_pad // tn,),
                in_specs=[
                    pl.BlockSpec((B, V_pad), lambda j: (0, 0)),                  # probs resident
                    pl.BlockSpec((pl.Squeezed(), V_pad, tn), lambda j: (j, 0, 0)),
                    pl.BlockSpec((1, tn), lambda j: (0, j)),
                    pl.BlockSpec((1, tn), lambda j: (0, j)),
                ],
                out_specs=pl.BlockSpec((B, tn), lambda j: (0, j)),
            ),
            compiler_params=pltpu.CompilerParams(
                dimension_semantics=("parallel",),
                vmem_limit_bytes=cfg["vmem_limit"]),
            cost_estimate=cost2,
        )(probs, gw, gamma, beta)
    else:
        tn, tk = cfg["tn"], cfg["tk"]
        cost2 = pl.CostEstimate(
            flops=2 * B * V_pad * V_pad,
            transcendentals=B * V_pad,
            bytes_accessed=int(gw.size * wb + 2 * B * V_pad * wb
                               + B * V_pad * 4 + 2 * V_pad * 4))
        out = pl.pallas_call(
            functools.partial(_gating_kernel_ktiled, eps=eps),
            out_shape=jax.ShapeDtypeStruct((B, V_pad), jnp.float32),
            grid_spec=pltpu.PrefetchScalarGridSpec(
                num_scalar_prefetch=0,
                grid=(V_pad // tn, V_pad // tk),
                in_specs=[
                    pl.BlockSpec((B, tk), lambda j, k: (0, k)),     # probs (K stream)
                    pl.BlockSpec((tk, tn), lambda j, k: (k, j)),    # gating_weights
                    pl.BlockSpec((B, tn), lambda j, k: (0, j)),     # probs (output tile)
                    pl.BlockSpec((1, tn), lambda j, k: (0, j)),     # BN gamma
                    pl.BlockSpec((1, tn), lambda j, k: (0, j)),     # BN beta
                ],
                out_specs=pl.BlockSpec((B, tn), lambda j, k: (0, j)),
                scratch_shapes=[pltpu.VMEM((B, tn), jnp.float32)],
            ),
            compiler_params=pltpu.CompilerParams(
                dimension_semantics=("parallel", "arbitrary"),
                vmem_limit_bytes=cfg["vmem_limit"]),
            cost_estimate=cost2,
        )(probs, gw, probs, gamma, beta)

    return out[:, :V]   # (B, vocab_size), matches probabilities.view(B, -1)


# ----------------------------------------------------------------------------
# Deterministic parameter init (mirrors shapes implied by MoeModel.__init__)
# ----------------------------------------------------------------------------
def init_params(key, input_size, vocab_size, num_mixtures=2):
    ks = jax.random.split(key, 5)
    b = 1.0 / math.sqrt(input_size)   # nn.Linear default init bound
    wg = jax.random.uniform(ks[0], (num_mixtures + 1, input_size, vocab_size),
                            jnp.float32, -b, b)           # gate_layer weights
    bg = jax.random.uniform(ks[1], (num_mixtures + 1, vocab_size), jnp.float32, -b, b)
    we = jax.random.uniform(ks[2], (num_mixtures, input_size, vocab_size),
                            jnp.float32, -b, b)           # expert_layer weights
    be = jax.random.uniform(ks[3], (num_mixtures, vocab_size), jnp.float32, -b, b)
    gw = jax.random.normal(ks[4], (vocab_size, vocab_size), jnp.float32) / math.sqrt(vocab_size)
    gamma = jnp.ones((1, vocab_size), jnp.float32)         # bn_gate scale
    beta = jnp.zeros((1, vocab_size), jnp.float32)         # bn_gate shift
    return dict(wg=wg, bg=bg, we=we, be=be, gw=gw, gamma=gamma, beta=beta)


# ----------------------------------------------------------------------------
# Pure-JAX reference for correctness
# ----------------------------------------------------------------------------
def ref_forward(x, p, num_mixtures=2, bn_eps=1e-5):
    g = jnp.einsum("bd,mdv->bmv", x, p["wg"]) + p["bg"][None]   # (B, M+1, V)
    gd = jax.nn.softmax(g, axis=0)                              # softmax over batch (dim 0)
    e = jnp.einsum("bd,mdv->bmv", x, p["we"]) + p["be"][None]   # (B, M, V)
    ed = jax.nn.sigmoid(e)
    probs = jnp.sum(gd[:, :num_mixtures, :] * ed, axis=1)       # (B, V)
    z = probs @ p["gw"]
    mean = z.mean(0, keepdims=True)
    var = ((z - mean) ** 2).mean(0, keepdims=True)
    gates = jax.nn.sigmoid(p["gamma"] * (z - mean) / jnp.sqrt(var + bn_eps) + p["beta"])
    return probs * gates


if __name__ == "__main__":
    # Small demo shapes; V=384 is not lane-aligned so the vocab-padding path runs,
    # and the auto-fit picks tile_v=256 -> a 2-tile grid (both v7x TensorCores busy).
    B, D, V, M = 8, 128, 384, 2    # batch, input_size, vocab_size, num_mixtures
    key = jax.random.PRNGKey(0)
    kx, kp = jax.random.split(key)
    x = jax.random.normal(kx, (B, D), jnp.float32)
    params = init_params(kp, D, V, M)
    ref = ref_forward(x, params, M)

    # Production path: bf16 weight streaming (f32 MXU accumulation) + approx reciprocal.
    packed = prepare_params(params, num_mixtures=M, batch_size=B)   # hoisted one-time packing
    out = jax.block_until_ready(moe_model_forward(x, packed))
    assert out.shape == (B, V), out.shape
    err_bf16 = float(jnp.max(jnp.abs(out - ref)))
    if err_bf16 >= 6e-2:
        raise AssertionError(f"bf16 path mismatch vs f32 reference, max abs err = {err_bf16}")

    # Exactness check: f32 weights, exact reciprocal (same packing / kernel code paths).
    packed_f32 = prepare_params(params, num_mixtures=M, batch_size=B,
                                weights_dtype=jnp.float32, approx_recip=False)
    out_f32 = jax.block_until_ready(moe_model_forward(x, packed_f32))
    err_f32 = float(jnp.max(jnp.abs(out_f32 - ref)))
    if err_f32 >= 2e-5:
        raise AssertionError(f"f32 path mismatch vs reference, max abs err = {err_f32}")

    # K-tiled gating fallback + per-mixture-dot stage 1 (paths used for huge vocabs).
    packed_kt = prepare_params(params, num_mixtures=M, batch_size=B, tile_n=256,
                               weights_dtype=jnp.float32, approx_recip=False,
                               fuse_stage1_dot=False, force_ktiled_gating=True)
    out_kt = jax.block_until_ready(moe_model_forward(x, packed_kt))
    err_kt = float(jnp.max(jnp.abs(out_kt - ref)))
    if err_kt >= 2e-5:
        raise AssertionError(f"k-tiled gating path mismatch vs reference, max abs err = {err_kt}")

    print("KERNEL_OK")
</pallas_src>

<mosaic_0001>
module attributes {stable_mosaic.version = 11 : i64} {
  func.func @_moe_probs_kernel(%arg0: i32, %arg1: memref<8x128xf32, #tpu.memory_space<vmem>>, %arg2: memref<1x128x1024xbf16, #tpu.memory_space<vmem>>, %arg3: memref<4x256xf32, #tpu.memory_space<vmem>>, %arg4: memref<8x256xbf16, #tpu.memory_space<vmem>>) attributes {dimension_semantics = [#tpu.dimension_semantics<parallel>], iteration_bounds = array<i64: 2>, scalar_prefetch = 0 : i64, scratch_operands = 0 : i64, tpu.core_type = #tpu.core_type<tc>, window_params = [{pipeline_mode = #tpu.pipeline_mode<synchronous>, transform_indices = @transform_0, window_bounds = array<i64: 8, 128>}, {transform_indices = @transform_1, window_bounds = array<i64: 1, 128, 1024>}, {transform_indices = @transform_2, window_bounds = array<i64: 4, 256>}, {transform_indices = @transform_3, window_bounds = array<i64: 8, 256>}]} {
    %c0 = arith.constant 0 : index
    %c0_0 = arith.constant 0 : index
    %0 = vector.load %arg1[%c0, %c0_0] : memref<8x128xf32, #tpu.memory_space<vmem>>, vector<8x128xf32>
    %1 = arith.truncf %0 : vector<8x128xf32> to vector<8x128xbf16>
    %c0_1 = arith.constant 0 : index
    %c0_2 = arith.constant 0 : index
    %2 = vector.load %arg3[%c0_1, %c0_2] : memref<4x256xf32, #tpu.memory_space<vmem>>, vector<4x256xf32>
    %c0_3 = arith.constant 0 : index
    %c0_4 = arith.constant 0 : index
    %c0_5 = arith.constant 0 : index
    %3 = vector.load %arg2[%c0_3, %c0_4, %c0_5] : memref<1x128x1024xbf16, #tpu.memory_space<vmem>>, vector<1x128x1024xbf16>
    %4 = vector.shape_cast %3 : vector<1x128x1024xbf16> to vector<128x1024xbf16>
    %cst = arith.constant dense<0.000000e+00> : vector<8x1024xf32>
    %5 = tpu.matmul %1, %4, %cst {dimension_numbers = #tpu.dot_dimension_numbers<[1], [0], [0], [1], [0, 0, 1, 1], [], []>} : vector<8x128xbf16>, vector<128x1024xbf16>, vector<8x1024xf32> -> vector<8x1024xf32>
    %cst_6 = arith.constant 0.000000e+00 : f32
    %6 = vector.broadcast %cst_6 : f32 to vector<8x256xf32>
    %7 = vector.extract_strided_slice %5 {offsets = [0, 0], sizes = [8, 256], strides = [1, 1]} : vector<8x1024xf32> to vector<8x256xf32>
    %8 = vector.extract_strided_slice %2 {offsets = [0, 0], sizes = [1, 256], strides = [1, 1]} : vector<4x256xf32> to vector<1x256xf32>
    %9 = vector.broadcast %8 : vector<1x256xf32> to vector<8x256xf32>
    %10 = arith.addf %7, %9 : vector<8x256xf32>
    %cst_7 = arith.constant dense<0xFF800000> : vector<256xf32>
    %11 = vector.multi_reduction <maximumf>, %10, %cst_7 [0] : vector<8x256xf32> to vector<256xf32>
    %12 = vector.shape_cast %11 : vector<256xf32> to vector<1x256xf32>
    %13 = vector.broadcast %12 : vector<1x256xf32> to vector<8x256xf32>
    %14 = arith.subf %10, %13 : vector<8x256xf32>
    %15 = math.exp %14 : vector<8x256xf32>
    %cst_8 = arith.constant dense<0.000000e+00> : vector<256xf32>
    %16 = vector.multi_reduction <add>, %15, %cst_8 [0] : vector<8x256xf32> to vector<256xf32>
    %17 = vector.shape_cast %16 : vector<256xf32> to vector<1x256xf32>
    %18 = tpu.reciprocal %17 {approx = true} : vector<1x256xf32> -> vector<1x256xf32>
    %19 = vector.broadcast %18 : vector<1x256xf32> to vector<8x256xf32>
    %20 = arith.mulf %15, %19 : vector<8x256xf32>
    %21 = vector.extract_strided_slice %5 {offsets = [0, 512], sizes = [8, 256], strides = [1, 1]} : vector<8x1024xf32> to vector<8x256xf32>
    %22 = vector.extract_strided_slice %2 {offsets = [2, 0], sizes = [1, 256], strides = [1, 1]} : vector<4x256xf32> to vector<1x256xf32>
    %23 = vector.broadcast %22 : vector<1x256xf32> to vector<8x256xf32>
    %24 = arith.addf %21, %23 : vector<8x256xf32>
    %25 = arith.negf %24 : vector<8x256xf32>
    %26 = math.exp %25 : vector<8x256xf32>
    %cst_9 = arith.constant 1.000000e+00 : f32
    %27 = vector.broadcast %cst_9 : f32 to vector<8x256xf32>
    %28 = arith.addf %27, %26 : vector<8x256xf32>
    %29 = arith.divf %27, %28 : vector<8x256xf32>
    %30 = arith.mulf %20, %29 : vector<8x256xf32>
    %31 = arith.addf %6, %30 : vector<8x256xf32>
    %32 = vector.extract_strided_slice %5 {offsets = [0, 256], sizes = [8, 256], strides = [1, 1]} : vector<8x1024xf32> to vector<8x256xf32>
    %33 = vector.extract_strided_slice %2 {offsets = [1, 0], sizes = [1, 256], strides = [1, 1]} : vector<4x256xf32> to vector<1x256xf32>
    %34 = vector.broadcast %33 : vector<1x256xf32> to vector<8x256xf32>
    %35 = arith.addf %32, %34 : vector<8x256xf32>
    %cst_10 = arith.constant dense<0xFF800000> : vector<256xf32>
    %36 = vector.multi_reduction <maximumf>, %35, %cst_10 [0] : vector<8x256xf32> to vector<256xf32>
    %37 = vector.shape_cast %36 : vector<256xf32> to vector<1x256xf32>
    %38 = vector.broadcast %37 : vector<1x256xf32> to vector<8x256xf32>
    %39 = arith.subf %35, %38 : vector<8x256xf32>
    %40 = math.exp %39 : vector<8x256xf32>
    %cst_11 = arith.constant dense<0.000000e+00> : vector<256xf32>
    %41 = vector.multi_reduction <add>, %40, %cst_11 [0] : vector<8x256xf32> to vector<256xf32>
    %42 = vector.shape_cast %41 : vector<256xf32> to vector<1x256xf32>
    %43 = tpu.reciprocal %42 {approx = true} : vector<1x256xf32> -> vector<1x256xf32>
    %44 = vector.broadcast %43 : vector<1x256xf32> to vector<8x256xf32>
    %45 = arith.mulf %40, %44 : vector<8x256xf32>
    %46 = vector.extract_strided_slice %5 {offsets = [0, 768], sizes = [8, 256], strides = [1, 1]} : vector<8x1024xf32> to vector<8x256xf32>
    %47 = vector.extract_strided_slice %2 {offsets = [3, 0], sizes = [1, 256], strides = [1, 1]} : vector<4x256xf32> to vector<1x256xf32>
    %48 = vector.broadcast %47 : vector<1x256xf32> to vector<8x256xf32>
    %49 = arith.addf %46, %48 : vector<8x256xf32>
    %50 = arith.negf %49 : vector<8x256xf32>
    %51 = math.exp %50 : vector<8x256xf32>
    %cst_12 = arith.constant 1.000000e+00 : f32
    %52 = vector.broadcast %cst_12 : f32 to vector<8x256xf32>
    %53 = arith.addf %52, %51 : vector<8x256xf32>
    %54 = arith.divf %52, %53 : vector<8x256xf32>
    %55 = arith.mulf %45, %54 : vector<8x256xf32>
    %56 = arith.addf %31, %55 : vector<8x256xf32>
    %57 = arith.truncf %56 : vector<8x256xf32> to vector<8x256xbf16>
    %c0_13 = arith.constant 0 : index
    %c0_14 = arith.constant 0 : index
    %58 = vector.load %arg4[%c0_13, %c0_14] : memref<8x256xbf16, #tpu.memory_space<vmem>>, vector<8x256xbf16>
    tpu.vector_store %arg4[%c0_13, %c0_14], %57 {strides = array<i32>} : memref<8x256xbf16, #tpu.memory_space<vmem>>, vector<8x256xbf16>,
    return
  }
  func.func @transform_0(%arg0: i32) -> (i32, i32) {
    %c0_i32 = arith.constant 0 : i32
    %c0_i32_0 = arith.constant 0 : i32
    %c0_i32_1 = arith.constant 0 : i32
    return %c0_i32, %c0_i32_0 : i32, i32
  }
  func.func @transform_1(%arg0: i32) -> (i32, i32, i32) {
    %c0_i32 = arith.constant 0 : i32
    %c0_i32_0 = arith.constant 0 : i32
    %c0_i32_1 = arith.constant 0 : i32
    return %arg0, %c0_i32, %c0_i32_0 : i32, i32, i32
  }
  func.func @transform_2(%arg0: i32) -> (i32, i32) {
    %c0_i32 = arith.constant 0 : i32
    %c0_i32_0 = arith.constant 0 : i32
    return %c0_i32, %arg0 : i32, i32
  }
  func.func @transform_3(%arg0: i32) -> (i32, i32) {
    %c0_i32 = arith.constant 0 : i32
    %c0_i32_0 = arith.constant 0 : i32
    return %c0_i32, %arg0 : i32, i32
  }
}

</mosaic_0001>

<bundles_post_ra>
// kernel: tpu_custom_call.1
= control target key start
LH: loop header
LB: loop body
LE: loop exit
PB: predicated region body
PF: predicated region fallthrough
CT: control target
= control target key end

     0   :  { %s2078_s0 = inlined_call_operand.hbm [shape: f32[8,128], index: 0, kind: input, shape index: {}]   ;;  %s2079_s1 = inlined_call_operand.hbm [shape: bf16[2,128,1024], index: 1, kind: input, shape index: {}]   ;;  %s2080_s2 = inlined_call_operand.hbm [shape: f32[4,512], index: 2, kind: input, shape index: {}]   ;;  %s2081_s3 = inlined_call_operand.hbm [shape: bf16[8,512], index: 3, kind: output, shape index: {}]  }
   0x1   :  { %2082 = sst [smem:[#allocation12_spill]] %s2078_s0 }
   0x2   :  { %8 = vsyncpa [#allocation3], 0 }
   0x3   :  { %9 = vsyncpa [#allocation6], 0 }
   0x4   :  { %11 = vsyncpa [#allocation6 + $0x1], 0 }
   0x5   :  { %12 = vsyncpa [#allocation4], 0 }
   0x6   :  { %14 = vsyncpa [#allocation4 + $0x1], 0  ;;  %s1670_s12 = smov 0   ;;  %s1672_s13 = smov 0  }
   0x7   :  { %s1674_s14 = smov 0   ;;  %s1676_s15 = smov 0  }
   0x8 LB: > { %s1691_s16 = sadd.s32 1, %s1645_s15   ;;  %s48_s17 = sadd.s32 1, %s1641_s14  ;;  %s1645_s15 = sphi %s1676_s15, %s2101_s15   ;;  %s1641_s14 = sphi %s1674_s14, %s2100_s14   ;;  %s1637_s13 = sphi %s1672_s13, %s2099_s13   ;;  %s1633_s12 = sphi %s1670_s12, %s2098_s12  }
   0x9   : > { %s45_s18 = ssub.s32 %s1645_s15, %s1691_s16  ;;  %p55_p0 = scmp.ne.s32.totalorder %s1641_s14, %s1637_s13 }
   0xa   : > { %p46_p1 = scmp.eq.s32.totalorder %s45_s18, 0  ;;  %p56_p2 = scmp.eq.s32.totalorder %s1645_s15, 0 }
   0xb   : > { %p1415_p4 = scmp.lt.s32.totalorder %s1645_s15, 2  ;;  %s149_s20 = sand.u32 1, %s1645_s15  }
   0xc   : > { %s1702_s19 = scalar_select %p46_p1, %s1641_s14, %s48_s17  }
   0xd   : > { %p57_p5 = por %p56_p2, %p55_p0  ;;  %s151_s21 = sand.u32 1, %s1641_s14  }
   0xe   : > { %s1046_s22 = sshll.u32 %s151_s21, 9  ;;  %s1322_s23 = sshll.u32 %s1645_s15, 9 }
   0xf   : > { %s158_s26 = scalar_lea.hbm %s2079_s1, %s1322_s23  ;;  %s153_s28 = scalar_lea.vmem [#allocation5], %s1046_s22 }
  0x10   : > { %s159_s27 = sshll.u32 %s158_s26, 4  ;;  %s161_s29 = sshll.u32 %s153_s28, 4  ;;  %s160_s27 = int_to_ptr.hbm [resolvable:$true] %s159_s27  ;;  %s162_s29 = int_to_ptr.vmem [resolvable:$true] %s161_s29 }
  0x11   : > { %p1717_p6 = pnand %p1415_p4, %p57_p5  ;;  %s1721_s4 = scalar_lea.sflag [#allocation6], %s149_s20 }
  0x12   : > { %s1485_s5 = sshra.s32 %s160_s27, 4  ;;  %s1492_s9 = scalar_lea.hbm %s2079_s1, 1024  ;;  %s1486_s5 = int_to_ptr.hbm [resolvable:$true] %s1485_s5 }
  0x13   : > { %s1487_s6 = scalar_lea.hbm %s1486_s5, 512  ;;  %p1489_p8 = pneg %p1717_p6 }
  0x14   : > { %p1488_p7 = scmp.ne.s32.totalorder %s1486_s5, %s1487_s6  ;;  %p1493_p11 = scmp.lt.s32.totalorder %s1486_s5, %s2079_s1 }
  0x15   : > { %p1494_p12 = scmp.lt.s32.totalorder %s1492_s9, %s1487_s6 }
  0x16   : > { %p1490_p9 = pnand %p1489_p8, %p1488_p7 }
  0x17   : > { %p1495_p13 = por %p1494_p12, %p1493_p11 }
  0x18   : > { %p1491_p10 = pneg %p1490_p9 }
  0x1a   : > { %p1496_p1 = pnand %p1495_p13, %p1491_p10 }
  0x1c   : > { %1499 = shalt.err (!%p1496_p1)
}
  0x1d   : > { %s1647_s17 = smov 512   ;;  %s1648_s18 = smov 32  }
  0x1e   : > { %1406 = dma.hbm_to_vmem [thread:$0]  (!%p1717_p6), %s160_s27, 8192, %s162_s29, %s1721_s4, %s1647_s17, %s1647_s17, %s1648_s18  }
  0x1f   : > { %s1738_s20 = sadd.s32 4294967295, %s1645_s15   ;;  %s1042_s22 = sadd.s32 4294967294, %s1645_s15  }
  0x20   : > { %p61_p2 = scmp.ne.s32.totalorder %s1637_s13, %s1633_s12  ;;  %p62_p4 = scmp.eq.s32.totalorder %s1738_s20, 0 }
  0x21   : > { %p111_p5 = scmp.eq.s32.totalorder %s1738_s20, 1  ;;  %p117_p7 = scmp.eq.s32.totalorder %s1042_s22, 1 }
  0x22   : > { %p1747_p9 = por %p62_p4, %p61_p2  ;;  %p1043_p10 = scmp.ge.s32.totalorder %s1645_s15, 1 }
  0x23   : > { %p1755_p11 = por %p111_p5, %p55_p0  ;;  %p1759_p12 = por %p117_p7, %p61_p2 }
  0x24   : > { %p124_p13 = scmp.lt.s32.totalorder %s1645_s15, 3  ;;  %s2087_s0 = sld [smem:[#allocation12_spill]] }
  0x25   : > { %s1649_s5 = smov [#allocation2]   ;;  %s1049_s7 = sshll.u32 %s151_s21, 3 }
  0x26   : > { %p1767_p1 = pnand %p1043_p10, %p124_p13  ;;  %s138_s6 = sshll.u32 %s1649_s5, 4  ;;  %s139_s6 = int_to_ptr.vmem [resolvable:$true] %s138_s6 }
  0x27   : > { %s1323_s8 = sshll.u32 %s1645_s15, 3  ;;  %s175_s18 = scalar_lea.vmem [#allocation7], %s1049_s7 }
  0x28   : > { %p1399_p0 = pneg %p1767_p1  ;;  %s180_s11 = scalar_lea.hbm %s2080_s2, %s1323_s8 }
  0x29   : > { %s182_s17 = sshll.u32 %s180_s11, 4  ;;  %s184_s22 = sshll.u32 %s175_s18, 4  ;;  %s183_s17 = int_to_ptr.hbm [resolvable:$true] %s182_s17  ;;  %s185_s22 = int_to_ptr.vmem [resolvable:$true] %s184_s22 }
  0x2a   : > { %s136_s28 = sshll.u32 %s2087_s0, 4  ;;  %p1400_p2 = pnand %p1399_p0, %p62_p4  ;;  %s137_s28 = int_to_ptr.hbm [resolvable:$true] %s136_s28 }
  0x2b   : > { %s1545_s26 = sshra.s32 %s183_s17, 4  ;;  %s1552_s0 = scalar_lea.hbm %s2080_s2, 16  ;;  %s1546_s26 = int_to_ptr.hbm [resolvable:$true] %s1545_s26 }
  0x2c   : > { %1402 = dma.hbm_to_vmem [thread:$0]  (!%p1400_p2), %s137_s28, 128, %s139_s6, [#allocation3]  }
  0x2d   : > { %s1547_s21 = scalar_lea.hbm %s1546_s26, 8  ;;  %p1553_p13 = scmp.lt.s32.totalorder %s1546_s26, %s2080_s2 }
  0x2e   : > { %p1548_p5 = scmp.ne.s32.totalorder %s1546_s26, %s1547_s21  ;;  %p1554_p0 = scmp.lt.s32.totalorder %s1552_s0, %s1547_s21 }
  0x30   : > { %p1550_p7 = pnand %p1548_p5, %p1489_p8  ;;  %p1555_p3 = por %p1554_p0, %p1553_p13 }
  0x32   : > { %p1551_p10 = pneg %p1550_p7 }
  0x34   : > { %p1556_p2 = pnand %p1555_p3, %p1551_p10 }
  0x36   : > { %1559 = shalt.err (!%p1556_p2)
}
  0x37   : > { %1409 = dma.hbm_to_vmem [thread:$0]  (!%p1717_p6), %s183_s17, 128, %s185_s22, %s1721_s4  }
  0x38   : > { %193 = sbr.rel (%p1767_p1) target bundleno = 307 (0x133), region = 32 }
  0x3d   : > { %1620 = dma.done.wait (%p62_p4), [#allocation3], 128  }
  0x3e   : > { %1622 = vsyncadd (%p62_p4), [#allocation3], 4294967168  ;;  %s200_s0 = sand.u32 1, %s1738_s20   ;;  %s1801_s28 = sand.u32 1, %s1637_s13  }
  0x3f   : > { %s1054_s6 = sshll.u32 %s1801_s28, 9  ;;  %s201_s30 = scalar_lea.sflag [#allocation6], %s200_s0 }
  0x40   : > { %s1804_s7 = scalar_lea.vmem [#allocation5], %s1054_s6 }
  0x41   : > { %1624 = dma.done.wait (%p1747_p9), %s201_s30, 8320  }
  0x42   : > { %1626 = vsyncadd (%p1747_p9), %s201_s30, 4294958976  ;;  %v1283_v0 = vld [vmem:[%s1804_s7 + $0x1c0] sm:$0xf]  ;;  %v1380_v2 = vld [vmem:[%s1804_s7 + $0x1c4] sm:$0xf]  ;;  %s1055_s4 = sshll.u32 %s1801_s28, 3 }
  0x43   : > { %v1384_v1 = vld [vmem:[%s1804_s7 + $0x1dc] sm:$0xf0]  ;;  %v1285_v4 = vld [vmem:[%s1804_s7 + $0x1e0] sm:$0xf0]  ;;  %v1291_v5 = vld [vmem:[%s1804_s7 + $0x1c8] sm:$0xf] }
  0x44   : > { %v1284_v3 = vor.u32 %v1384_v1, %v1283_v0  ;;  %v1385_v6 = vld [vmem:[%s1804_s7 + $0x1e4] sm:$0xf0]  ;;  %v1288_v7 = vor.u32 %v1380_v2, %v1285_v4  ;;  %v1381_v9 = vld [vmem:[%s1804_s7 + $0x1cc] sm:$0xf]  ;;  %v1251_v11 = vld [vmem:[%s1804_s7 + $0x180] sm:$0xf] }
  0x45   : > { %v1292_v8 = vor.u32 %v1385_v6, %v1291_v5  ;;  %v1293_v10 = vld [vmem:[%s1804_s7 + $0x1e8] sm:$0xf0]  ;;  %v1376_v13 = vld [vmem:[%s1804_s7 + $0x19c] sm:$0xf0]  ;;  %v1372_v14 = vld [vmem:[%s1804_s7 + $0x184] sm:$0xf] }
  0x46   : > { %632 = vmatpush.bf16.msra.mxu0 %v1284_v3  ;;  %v1296_v12 = vor.u32 %v1381_v9, %v1293_v10  ;;  %v1253_v15 = vld [vmem:[%s1804_s7 + $0x1a0] sm:$0xf0]  ;;  %645 = vmatpush.bf16.msra.mxu1 %v1288_v7  ;;  %v1252_v16 = vor.u32 %v1376_v13, %v1251_v11  ;;  %v1259_v18 = vld [vmem:[%s1804_s7 + $0x188] sm:$0xf]  ;;  %v1373_v20 = vld [vmem:[%s1804_s7 + $0x18c] sm:$0xf] }
  0x47   : > { %658 = vmatpush.bf16.msra.mxu2 %v1292_v8  ;;  %v1256_v17 = vor.u32 %v1372_v14, %v1253_v15  ;;  %v1377_v19 = vld [vmem:[%s1804_s7 + $0x1a4] sm:$0xf0]  ;;  %v1261_v22 = vld [vmem:[%s1804_s7 + $0x1a8] sm:$0xf0]  ;;  %v1219_v23 = vld [vmem:[%s1804_s7 + $0x140] sm:$0xf] }
  0x48   : > { %671 = vmatpush.bf16.msra.mxu3 %v1296_v12  ;;  %v1260_v21 = vor.u32 %v1377_v19, %v1259_v18  ;;  %v1368_v24 = vld [vmem:[%s1804_s7 + $0x15c] sm:$0xf0]  ;;  %v1264_v25 = vor.u32 %v1373_v20, %v1261_v22  ;;  %v1364_v26 = vld [vmem:[%s1804_s7 + $0x144] sm:$0xf]  ;;  %v1227_v28 = vld [vmem:[%s1804_s7 + $0x148] sm:$0xf] }
  0x49   : > { %v1221_v27 = vld [vmem:[%s1804_s7 + $0x160] sm:$0xf0]  ;;  %v1220_v29 = vor.u32 %v1368_v24, %v1219_v23  ;;  %v1369_v30 = vld [vmem:[%s1804_s7 + $0x164] sm:$0xf0]  ;;  %v1365_v31 = vld [vmem:[%s1804_s7 + $0x14c] sm:$0xf] }
  0x4a   : > { %633 = vmatpush.bf16.msra.mxu0 %v1252_v16  ;;  %v1229_v32 = vld [vmem:[%s1804_s7 + $0x168] sm:$0xf0]  ;;  %646 = vmatpush.bf16.msra.mxu1 %v1256_v17  ;;  %v1224_v33 = vor.u32 %v1364_v26, %v1221_v27  ;;  %v1228_v34 = vor.u32 %v1369_v30, %v1227_v28  ;;  %v1187_v35 = vld [vmem:[%s1804_s7 + $0x100] sm:$0xf]  ;;  %v1356_v37 = vld [vmem:[%s1804_s7 + $0x104] sm:$0xf] }
  0x4b   : > { %659 = vmatpush.bf16.msra.mxu2 %v1260_v21  ;;  %v1360_v36 = vld [vmem:[%s1804_s7 + $0x11c] sm:$0xf0]  ;;  %v1232_v38 = vor.u32 %v1365_v31, %v1229_v32  ;;  %v1189_v39 = vld [vmem:[%s1804_s7 + $0x120] sm:$0xf0]  ;;  %v1195_v40 = vld [vmem:[%s1804_s7 + $0x108] sm:$0xf] }
  0x4c   : > { %672 = vmatpush.bf16.msra.mxu3 %v1264_v25  ;;  %v1361_v41 = vld [vmem:[%s1804_s7 + $0x124] sm:$0xf0]  ;;  %v1357_v42 = vld [vmem:[%s1804_s7 + $0x10c] sm:$0xf]  ;;  %v1188_v44 = vor.u32 %v1360_v36, %v1187_v35  ;;  %v1192_v45 = vor.u32 %v1356_v37, %v1189_v39  ;;  %v1155_v47 = vld [vmem:[%s1804_s7 + $0xc0] sm:$0xf] }
  0x4d   : > { %v1197_v43 = vld [vmem:[%s1804_s7 + $0x128] sm:$0xf0]  ;;  %v1196_v46 = vor.u32 %v1361_v41, %v1195_v40  ;;  %v1352_v48 = vld [vmem:[%s1804_s7 + $0xdc] sm:$0xf0]  ;;  %v1348_v49 = vld [vmem:[%s1804_s7 + $0xc4] sm:$0xf] }
  0x4e   : > { %634 = vmatpush.bf16.msra.mxu0 %v1220_v29  ;;  %647 = vmatpush.bf16.msra.mxu1 %v1224_v33  ;;  %v1200_v50 = vor.u32 %v1357_v42, %v1197_v43  ;;  %v1157_v51 = vld [vmem:[%s1804_s7 + $0xe0] sm:$0xf0]  ;;  %v1163_v52 = vld [vmem:[%s1804_s7 + $0xc8] sm:$0xf]  ;;  %v1349_v54 = vld [vmem:[%s1804_s7 + $0xcc] sm:$0xf]  ;;  %v1156_v56 = vor.u32 %v1352_v48, %v1155_v47 }
  0x4f   : > { %660 = vmatpush.bf16.msra.mxu2 %v1228_v34  ;;  %v1353_v53 = vld [vmem:[%s1804_s7 + $0xe4] sm:$0xf0]  ;;  %v1165_v55 = vld [vmem:[%s1804_s7 + $0xe8] sm:$0xf0]  ;;  %v1160_v57 = vor.u32 %v1348_v49, %v1157_v51  ;;  %v1123_v59 = vld [vmem:[%s1804_s7 + $0x80] sm:$0xf] }
  0x50   : > { %673 = vmatpush.bf16.msra.mxu3 %v1232_v38  ;;  %v1164_v58 = vor.u32 %v1353_v53, %v1163_v52  ;;  %v1344_v60 = vld [vmem:[%s1804_s7 + $0x9c] sm:$0xf0]  ;;  %v1340_v61 = vld [vmem:[%s1804_s7 + $0x84] sm:$0xf]  ;;  %v1168_v62 = vor.u32 %v1349_v54, %v1165_v55  ;;  %v1131_v0 = vld [vmem:[%s1804_s7 + $0x88] sm:$0xf] }
  0x51   : > { %v1125_v63 = vld [vmem:[%s1804_s7 + $0xa0] sm:$0xf0]  ;;  %v1345_v1 = vld [vmem:[%s1804_s7 + $0xa4] sm:$0xf0]  ;;  %v1341_v2 = vld [vmem:[%s1804_s7 + $0x8c] sm:$0xf]  ;;  %v1124_v4 = vor.u32 %v1344_v60, %v1123_v59 }
  0x52   : > { %635 = vmatpush.bf16.msra.mxu0 %v1188_v44  ;;  %648 = vmatpush.bf16.msra.mxu1 %v1192_v45  ;;  %v1133_v3 = vld [vmem:[%s1804_s7 + $0xa8] sm:$0xf0]  ;;  %v1128_v5 = vor.u32 %v1340_v61, %v1125_v63  ;;  %v1132_v6 = vor.u32 %v1345_v1, %v1131_v0  ;;  %v1091_v7 = vld [vmem:[%s1804_s7 + $0x40] sm:$0xf]  ;;  %v1332_v9 = vld [vmem:[%s1804_s7 + $0x44] sm:$0xf] }
  0x53   : > { %661 = vmatpush.bf16.msra.mxu2 %v1196_v46  ;;  %v1336_v8 = vld [vmem:[%s1804_s7 + $0x5c] sm:$0xf0]  ;;  %v1136_v10 = vor.u32 %v1341_v2, %v1133_v3  ;;  %v1093_v11 = vld [vmem:[%s1804_s7 + $0x60] sm:$0xf0]  ;;  %v1099_v12 = vld [vmem:[%s1804_s7 + $0x48] sm:$0xf] }
  0x54   : > { %674 = vmatpush.bf16.msra.mxu3 %v1200_v50  ;;  %v1337_v13 = vld [vmem:[%s1804_s7 + $0x64] sm:$0xf0]  ;;  %v1333_v14 = vld [vmem:[%s1804_s7 + $0x4c] sm:$0xf]  ;;  %v1092_v16 = vor.u32 %v1336_v8, %v1091_v7  ;;  %v1059_v17 = vld [vmem:[%s1804_s7] sm:$0xf]  ;;  %v1096_v19 = vor.u32 %v1332_v9, %v1093_v11 }
  0x55   : > { %v1101_v15 = vld [vmem:[%s1804_s7 + $0x68] sm:$0xf0]  ;;  %v1328_v18 = vld [vmem:[%s1804_s7 + $0x1c] sm:$0xf0]  ;;  %v1100_v20 = vor.u32 %v1337_v13, %v1099_v12  ;;  %v1324_v21 = vld [vmem:[%s1804_s7 + $0x4] sm:$0xf] }
  0x56   : > { %636 = vmatpush.bf16.msra.mxu0 %v1156_v56  ;;  %649 = vmatpush.bf16.msra.mxu1 %v1160_v57  ;;  %v1061_v22 = vld [vmem:[%s1804_s7 + $0x20] sm:$0xf0]  ;;  %v1067_v23 = vld [vmem:[%s1804_s7 + $0x8] sm:$0xf]  ;;  %v1104_v24 = vor.u32 %v1333_v14, %v1101_v15  ;;  %v1325_v26 = vld [vmem:[%s1804_s7 + $0xc] sm:$0xf]  ;;  %v1060_v31 = vor.u32 %v1328_v18, %v1059_v17 }
  0x57   : > { %662 = vmatpush.bf16.msra.mxu2 %v1164_v58  ;;  %v1329_v25 = vld [vmem:[%s1804_s7 + $0x24] sm:$0xf0]  ;;  %v1069_v27 = vld [vmem:[%s1804_s7 + $0x28] sm:$0xf0]  ;;  %v1299_v28 = vld [vmem:[%s1804_s7 + $0x1d0] sm:$0xf]  ;;  %v1064_v35 = vor.u32 %v1324_v21, %v1061_v22 }
  0x58   : > { %675 = vmatpush.bf16.msra.mxu3 %v1168_v62  ;;  %v1386_v29 = vld [vmem:[%s1804_s7 + $0x1ec] sm:$0xf0]  ;;  %v1382_v30 = vld [vmem:[%s1804_s7 + $0x1d4] sm:$0xf]  ;;  %v1307_v33 = vld [vmem:[%s1804_s7 + $0x1d8] sm:$0xf]  ;;  %v1068_v36 = vor.u32 %v1329_v25, %v1067_v23  ;;  %v1072_v40 = vor.u32 %v1325_v26, %v1069_v27 }
  0x59   : > { %v1301_v32 = vld [vmem:[%s1804_s7 + $0x1f0] sm:$0xf0]  ;;  %v1387_v34 = vld [vmem:[%s1804_s7 + $0x1f4] sm:$0xf0]  ;;  %v1383_v37 = vld [vmem:[%s1804_s7 + $0x1dc] sm:$0xf]  ;;  %v1300_v41 = vor.u32 %v1386_v29, %v1299_v28 }
  0x5a   : > { %637 = vmatpush.bf16.msra.mxu0 %v1124_v4  ;;  %650 = vmatpush.bf16.msra.mxu1 %v1128_v5  ;;  %v1309_v38 = vld [vmem:[%s1804_s7 + $0x1f8] sm:$0xf0]  ;;  %v1304_v42 = vor.u32 %v1382_v30, %v1301_v32  ;;  %v1308_v43 = vor.u32 %v1387_v34, %v1307_v33  ;;  %v1267_v44 = vld [vmem:[%s1804_s7 + $0x190] sm:$0xf]  ;;  %v1374_v46 = vld [vmem:[%s1804_s7 + $0x194] sm:$0xf] }
  0x5b   : > { %663 = vmatpush.bf16.msra.mxu2 %v1132_v6  ;;  %v245_v39 = vld [vmem:[#allocation2] sm:$0xff]  ;;  %v1378_v45 = vld [vmem:[%s1804_s7 + $0x1ac] sm:$0xf0]  ;;  %v1312_v47 = vor.u32 %v1383_v37, %v1309_v38  ;;  %v1269_v49 = vld [vmem:[%s1804_s7 + $0x1b0] sm:$0xf0]  ;;  %s214_s23 = scalar_lea.vmem [#allocation7], %s1055_s4 }
  0x5c   : > { %676 = vmatpush.bf16.msra.mxu3 %v1136_v10  ;;  %v1885_v48 = vpack.c.bf16 %v245_v39, %v245_v39  ;;  %v1275_v50 = vld [vmem:[%s1804_s7 + $0x198] sm:$0xf]  ;;  %v1375_v52 = vld [vmem:[%s1804_s7 + $0x19c] sm:$0xf]  ;;  %v1268_v54 = vor.u32 %v1378_v45, %v1267_v44  ;;  %v1272_v55 = vor.u32 %v1374_v46, %v1269_v49  ;;  %v1235_v57 = vld [vmem:[%s1804_s7 + $0x150] sm:$0xf] }
  0x5d   : > { %v1379_v51 = vld [vmem:[%s1804_s7 + $0x1b4] sm:$0xf0]  ;;  %v1277_v53 = vld [vmem:[%s1804_s7 + $0x1b8] sm:$0xf0]  ;;  %v1370_v58 = vld [vmem:[%s1804_s7 + $0x16c] sm:$0xf0] }
  0x5e   : > { %638 = vmatpush.bf16.msra.mxu0 %v1092_v16  ;;  %651 = vmatpush.bf16.msra.mxu1 %v1096_v19  ;;  %v1276_v56 = vor.u32 %v1379_v51, %v1275_v50  ;;  %v1366_v59 = vld [vmem:[%s1804_s7 + $0x154] sm:$0xf]  ;;  %v1280_v60 = vor.u32 %v1375_v52, %v1277_v53  ;;  %v1243_v62 = vld [vmem:[%s1804_s7 + $0x158] sm:$0xf]  ;;  %v1367_v0 = vld [vmem:[%s1804_s7 + $0x15c] sm:$0xf]  ;;  %v1236_v2 = vor.u32 %v1370_v58, %v1235_v57 }
  0x5f   : > { %664 = vmatpush.bf16.msra.mxu2 %v1100_v20  ;;  %v1237_v61 = vld [vmem:[%s1804_s7 + $0x170] sm:$0xf0]  ;;  %v1371_v63 = vld [vmem:[%s1804_s7 + $0x174] sm:$0xf0]  ;;  %v1245_v1 = vld [vmem:[%s1804_s7 + $0x178] sm:$0xf0] }
  0x60   : > { %677 = vmatpush.bf16.msra.mxu3 %v1104_v24  ;;  %v1240_v3 = vor.u32 %v1366_v59, %v1237_v61  ;;  %v1244_v4 = vor.u32 %v1371_v63, %v1243_v62  ;;  %v1203_v5 = vld [vmem:[%s1804_s7 + $0x110] sm:$0xf]  ;;  %v1358_v7 = vld [vmem:[%s1804_s7 + $0x114] sm:$0xf]  ;;  %v1248_v8 = vor.u32 %v1367_v0, %v1245_v1  ;;  %v1211_v10 = vld [vmem:[%s1804_s7 + $0x118] sm:$0xf] }
  0x61   : > { %v1362_v6 = vld [vmem:[%s1804_s7 + $0x12c] sm:$0xf0]  ;;  %v1205_v9 = vld [vmem:[%s1804_s7 + $0x130] sm:$0xf0]  ;;  %v1363_v11 = vld [vmem:[%s1804_s7 + $0x134] sm:$0xf0] }
  0x62   : > { %639 = vmatpush.bf16.msra.mxu0 %v1060_v31  ;;  %652 = vmatpush.bf16.msra.mxu1 %v1064_v35  ;;  %v1359_v12 = vld [vmem:[%s1804_s7 + $0x11c] sm:$0xf]  ;;  %v1204_v14 = vor.u32 %v1362_v6, %v1203_v5  ;;  %v1208_v15 = vor.u32 %v1358_v7, %v1205_v9  ;;  %v1212_v16 = vor.u32 %v1363_v11, %v1211_v10  ;;  %v1171_v17 = vld [vmem:[%s1804_s7 + $0xd0] sm:$0xf]  ;;  %v1350_v19 = vld [vmem:[%s1804_s7 + $0xd4] sm:$0xf] }
  0x63   : > { %665 = vmatpush.bf16.msra.mxu2 %v1068_v36  ;;  %v1213_v13 = vld [vmem:[%s1804_s7 + $0x138] sm:$0xf0]  ;;  %v1354_v18 = vld [vmem:[%s1804_s7 + $0xec] sm:$0xf0]  ;;  %v1173_v21 = vld [vmem:[%s1804_s7 + $0xf0] sm:$0xf0] }
  0x64   : > { %678 = vmatpush.bf16.msra.mxu3 %v1072_v40  ;;  %v1216_v20 = vor.u32 %v1359_v12, %v1213_v13  ;;  %v1179_v22 = vld [vmem:[%s1804_s7 + $0xd8] sm:$0xf]  ;;  %v1351_v24 = vld [vmem:[%s1804_s7 + $0xdc] sm:$0xf]  ;;  %v1172_v26 = vor.u32 %v1354_v18, %v1171_v17  ;;  %v1176_v27 = vor.u32 %v1350_v19, %v1173_v21  ;;  %v1139_v29 = vld [vmem:[%s1804_s7 + $0x90] sm:$0xf] }
  0x65   : > { %640 = vmatmul.bf16.vlgmr.msra.gmra.mxu0 %v1885_v48  ;;  %653 = vmatmul.bf16.vlgmr.msra.gmra.mxu1 %v1885_v48  ;;  %v1355_v23 = vld [vmem:[%s1804_s7 + $0xf4] sm:$0xf0]  ;;  %v1181_v25 = vld [vmem:[%s1804_s7 + $0xf8] sm:$0xf0]  ;;  %v1346_v30 = vld [vmem:[%s1804_s7 + $0xac] sm:$0xf0] }
  0x66   : > { %684 = vmatpush.bf16.msrb.mxu0 %v1300_v41  ;;  %697 = vmatpush.bf16.msrb.mxu1 %v1304_v42  ;;  %v1180_v28 = vor.u32 %v1355_v23, %v1179_v22  ;;  %v1342_v31 = vld [vmem:[%s1804_s7 + $0x94] sm:$0xf]  ;;  %v1184_v32 = vor.u32 %v1351_v24, %v1181_v25  ;;  %v1147_v34 = vld [vmem:[%s1804_s7 + $0x98] sm:$0xf]  ;;  %v1343_v36 = vld [vmem:[%s1804_s7 + $0x9c] sm:$0xf]  ;;  %v1140_v38 = vor.u32 %v1346_v30, %v1139_v29 }
  0x67   : > { %710 = vmatpush.bf16.msrb.mxu2 %v1308_v43  ;;  %679 = vmatmul.bf16.vlgmr.msra.gmra.mxu3 %v1885_v48  ;;  %v1141_v33 = vld [vmem:[%s1804_s7 + $0xb0] sm:$0xf0]  ;;  %v1347_v35 = vld [vmem:[%s1804_s7 + $0xb4] sm:$0xf0]  ;;  %v1149_v37 = vld [vmem:[%s1804_s7 + $0xb8] sm:$0xf0] }
  0x68   : > { %723 = vmatpush.bf16.msrb.mxu3 %v1312_v47  ;;  %666 = vmatmul.bf16.vlgmr.msra.gmra.mxu2 %v1885_v48  ;;  %v1144_v39 = vor.u32 %v1342_v31, %v1141_v33  ;;  %v1148_v40 = vor.u32 %v1347_v35, %v1147_v34  ;;  %v1107_v41 = vld [vmem:[%s1804_s7 + $0x50] sm:$0xf]  ;;  %v1334_v43 = vld [vmem:[%s1804_s7 + $0x54] sm:$0xf]  ;;  %v1152_v44 = vor.u32 %v1343_v36, %v1149_v37  ;;  %v1115_v46 = vld [vmem:[%s1804_s7 + $0x58] sm:$0xf] }
  0x69   : > { %v1338_v42 = vld [vmem:[%s1804_s7 + $0x6c] sm:$0xf0]  ;;  %v1109_v45 = vld [vmem:[%s1804_s7 + $0x70] sm:$0xf0]  ;;  %v1339_v47 = vld [vmem:[%s1804_s7 + $0x74] sm:$0xf0] }
  0x6a   : > { %685 = vmatpush.bf16.msrb.mxu0 %v1268_v54  ;;  %698 = vmatpush.bf16.msrb.mxu1 %v1272_v55  ;;  %v1335_v49 = vld [vmem:[%s1804_s7 + $0x5c] sm:$0xf]  ;;  %v1108_v51 = vor.u32 %v1338_v42, %v1107_v41  ;;  %v1112_v52 = vor.u32 %v1334_v43, %v1109_v45  ;;  %v1116_v53 = vor.u32 %v1339_v47, %v1115_v46  ;;  %v1075_v54 = vld [vmem:[%s1804_s7 + $0x10] sm:$0xf]  ;;  %v1077_v58 = vld [vmem:[%s1804_s7 + $0x30] sm:$0xf0] }
  0x6b   : > { %711 = vmatpush.bf16.msrb.mxu2 %v1276_v56  ;;  %v1117_v50 = vld [vmem:[%s1804_s7 + $0x78] sm:$0xf0]  ;;  %v1330_v55 = vld [vmem:[%s1804_s7 + $0x2c] sm:$0xf0]  ;;  %v1326_v56 = vld [vmem:[%s1804_s7 + $0x14] sm:$0xf] }
  0x6c   : > { %724 = vmatpush.bf16.msrb.mxu3 %v1280_v60  ;;  %v1120_v57 = vor.u32 %v1335_v49, %v1117_v50  ;;  %v1083_v59 = vld [vmem:[%s1804_s7 + $0x18] sm:$0xf]  ;;  %v1327_v61 = vld [vmem:[%s1804_s7 + $0x1c] sm:$0xf]  ;;  %v1076_v63 = vor.u32 %v1330_v55, %v1075_v54  ;;  %v1080_v0 = vor.u32 %v1326_v56, %v1077_v58  ;;  %s1388_s29 = sshll.u32 %s1738_s20, 3  ;;  %s242_s17 = scalar_lea.vmem [#allocation8], %s1055_s4 }
  0x6d   : > { %v1331_v60 = vld [vmem:[%s1804_s7 + $0x34] sm:$0xf0]  ;;  %v1085_v62 = vld [vmem:[%s1804_s7 + $0x38] sm:$0xf0]  ;;  %s935_s11 = scalar_lea.hbm %s2081_s3, %s1388_s29  ;;  %s937_s18 = sshll.u32 %s242_s17, 4  ;;  %s938_s18 = int_to_ptr.vmem [resolvable:$true] %s937_s18 }
  0x6e   : > { %686 = vmatpush.bf16.msrb.mxu0 %v1236_v2  ;;  %699 = vmatpush.bf16.msrb.mxu1 %v1240_v3  ;;  %v1084_v1 = vor.u32 %v1331_v60, %v1083_v59  ;;  %v1088_v2 = vor.u32 %v1327_v61, %v1085_v62  ;;  %v1951_v3 = vld [vmem:[%s214_s23] sm:$0xff]  ;;  %s939_s22 = sshll.u32 %s935_s11, 4  ;;  %s924_s26 = scalar_lea.sflag [#allocation4], %s1801_s28  ;;  %s940_s22 = int_to_ptr.hbm [resolvable:$true] %s939_s22 }
  0x6f   : > { %712 = vmatpush.bf16.msrb.mxu2 %v1244_v4  ;;  %v737_v4 = vperm.slane %v1951_v3, 0  ;;  %v738_v5 = vperm.slane %v1951_v3, 4  ;;  %v829_v9 = vperm.slane %v1951_v3, 1  ;;  %v830_v12 = vperm.slane %v1951_v3, 5  ;;  %s1589_s21 = sshra.s32 %s940_s22, 4  ;;  %s1595_s8 = scalar_lea.hbm %s2081_s3, 16  ;;  %s1590_s21 = int_to_ptr.hbm [resolvable:$true] %s1589_s21 }
  0x70   : > { %725 = vmatpush.bf16.msrb.mxu3 %v1248_v8  ;;  %v780_v55 = vperm.slane %v1951_v3, 6  ;;  %s1591_s27 = scalar_lea.hbm %s1590_s21, 8  ;;  %p1596_p4 = scmp.lt.s32.totalorder %s1590_s21, %s2081_s3 }
  0x71   : > { %v741_v6 = vperm.slane %v737_v4, 0  ;;  %v742_v7 = vperm.slane %v738_v5, 0  ;;  %v834_v17 = vperm.slane %v830_v12, 1  ;;  %v872_v4 = vperm.slane %v1951_v3, 7  ;;  %p1592_p3 = scmp.ne.s32.totalorder %s1590_s21, %s1591_s27  ;;  %p1597_p9 = scmp.lt.s32.totalorder %s1595_s8, %s1591_s27 }
  0x72   : > { %687 = vmatpush.bf16.msrb.mxu0 %v1204_v14  ;;  %700 = vmatpush.bf16.msrb.mxu1 %v1208_v15  ;;  %v833_v15 = vperm.slane %v829_v9, 1  ;;  %v784_v61 = vperm.slane %v780_v55, 2 }
  0x73   : > { %713 = vmatpush.bf16.msrb.mxu2 %v1212_v16  ;;  %p1593_p6 = pnand %p1592_p3, %p1755_p11  ;;  %p1598_p1 = por %p1597_p9, %p1596_p4 }
  0x74   : > { %726 = vmatpush.bf16.msrb.mxu3 %v1216_v20 }
  0x75   : > { %p1594_p8 = pneg %p1593_p6 }
  0x76   : > { %688 = vmatpush.bf16.msrb.mxu0 %v1172_v26  ;;  %701 = vmatpush.bf16.msrb.mxu1 %v1176_v27 }
  0x77   : > { %714 = vmatpush.bf16.msrb.mxu2 %v1180_v28  ;;  %p1599_p5 = pnand %p1598_p1, %p1594_p8 }
  0x78   : > { %727 = vmatpush.bf16.msrb.mxu3 %v1184_v32 }
  0x7a   : > { %689 = vmatpush.bf16.msrb.mxu0 %v1140_v38  ;;  %702 = vmatpush.bf16.msrb.mxu1 %v1144_v39 }
  0x7b   : > { %715 = vmatpush.bf16.msrb.mxu2 %v1148_v40 }
  0x7c   : > { %728 = vmatpush.bf16.msrb.mxu3 %v1152_v44 }
  0x7e   : > { %690 = vmatpush.bf16.msrb.mxu0 %v1108_v51  ;;  %703 = vmatpush.bf16.msrb.mxu1 %v1112_v52 }
  0x7f   : > { %716 = vmatpush.bf16.msrb.mxu2 %v1116_v53  ;;  %v779_v53 = vperm.slane %v1951_v3, 2 }
  0x80   : > { %729 = vmatpush.bf16.msrb.mxu3 %v1120_v57 }
  0x81   : > { %v783_v59 = vperm.slane %v779_v53, 2 }
  0x82   : > { %691 = vmatpush.bf16.msrb.mxu0 %v1076_v63  ;;  %704 = vmatpush.bf16.msrb.mxu1 %v1080_v0  ;;  %v871_v0 = vperm.slane %v1951_v3, 3 }
  0x83   : > { %717 = vmatpush.bf16.msrb.mxu2 %v1084_v1 }
  0x84   : > { %730 = vmatpush.bf16.msrb.mxu3 %v1088_v2 }
  0x85   : > { %692 = vmatmul.bf16.vlgmr.msrb.gmra.mxu0 %v1885_v48  ;;  %705 = vmatmul.bf16.vlgmr.msrb.gmra.mxu1 %v1885_v48 }
  0x86   : > { %718 = vmatmul.bf16.vlgmr.msrb.gmra.mxu2 %v1885_v48 }
  0x87   : > { %731 = vmatmul.bf16.vlgmr.msrb.gmra.mxu3 %v1885_v48 }
  0xe2   : > { %v641_v8 = vpop.f32.mrf.mxu0  ;;  %v654_v11 = vpop.f32.mrf.mxu1 }
  0xe3   : > { %v743_v10 = vadd.f32 %v741_v6, %v641_v8  ;;  %v744_v13 = vadd.f32 %v742_v7, %v654_v11 }
  0xe5   : > { %v745_v48 = vrot.slane %v743_v10, 4  ;;  %v751_v14 = vrot.slane %v744_v13, 4 }
  0xe7   : > { %v746_v16 = vmax.f32 %v743_v10, %v745_v48  ;;  %v752_v18 = vmax.f32 %v744_v13, %v751_v14  ;;  %v876_v14 = vperm.slane %v872_v4, 3 }
  0xe9   : > { %v747_v19 = vrot.slane %v746_v16, 2  ;;  %v753_v21 = vrot.slane %v752_v18, 2 }
  0xea   : > { %v680_v23 = vpop.f32.mrf.mxu3  ;;  %v643_v24 = vpop.f32.mrf.mxu0 }
  0xeb   : > { %v667_v20 = vpop.f32.mrf.mxu2  ;;  %v748_v25 = vmax.f32 %v746_v16, %v747_v19  ;;  %v836_v26 = vadd.f32 %v834_v17, %v680_v23  ;;  %v656_v27 = vpop.f32.mrf.mxu1  ;;  %v754_v28 = vmax.f32 %v752_v18, %v753_v21 }
  0xec   : > { %v835_v22 = vadd.f32 %v833_v15, %v667_v20 }
  0xed   : > { %v749_v30 = vrot.slane %v748_v25, 1  ;;  %v843_v31 = vrot.slane %v836_v26, 4  ;;  %v755_v32 = vrot.slane %v754_v28, 1 }
  0xee   : > { %v837_v29 = vrot.slane %v835_v22, 4 }
  0xef   : > { %v750_v34 = vmax.f32 %v748_v25, %v749_v30  ;;  %v844_v35 = vmax.f32 %v836_v26, %v843_v31  ;;  %v756_v36 = vmax.f32 %v754_v28, %v755_v32 }
  0xf0   : > { %v838_v33 = vmax.f32 %v835_v22, %v837_v29 }
  0xf1   : > { %v757_v38 = vsub.f32 %v743_v10, %v750_v34  ;;  %v845_v39 = vrot.slane %v844_v35, 2  ;;  %v758_v41 = vsub.f32 %v744_v13, %v756_v36  ;;  %v875_v13 = vperm.slane %v871_v0, 3 }
  0xf2   : > { %v839_v37 = vrot.slane %v838_v33, 2  ;;  %v682_v43 = vpop.f32.mrf.mxu3 }
  0xf3   : > { %v669_v40 = vpop.f32.mrf.mxu2  ;;  %v759_v44 = vmul.f32 1.442695, %v757_v38  ;;  %v846_v45 = vmax.f32 %v844_v35, %v845_v39  ;;  %v761_v46 = vmul.f32 1.442695, %v758_v41 }
  0xf4   : > { %v840_v42 = vmax.f32 %v838_v33, %v839_v37 }
  0xf5   : > { %1453 = vpow2.f32 %v759_v44  ;;  %v847_v49 = vrot.slane %v846_v45, 1 }
  0xf6   : > { %v841_v47 = vrot.slane %v840_v42, 1  ;;  %1455 = vpow2.f32 %v761_v46 }
  0xf7   : > { %v848_v51 = vmax.f32 %v846_v45, %v847_v49 }
  0xf8   : > { %v842_v50 = vmax.f32 %v840_v42, %v841_v47 }
  0xf9   : > { %v850_v54 = vsub.f32 %v836_v26, %v848_v51 }
  0xfa   : > { %v849_v52 = vsub.f32 %v835_v22, %v842_v50 }
  0xfb   : > { %v1959_v57 = vpop.eup %1453  ;;  %v853_v58 = vmul.f32 1.442695, %v850_v54 }
  0xfc   : > { %v851_v56 = vmul.f32 1.442695, %v849_v52  ;;  %v763_v60 = vrot.slane %v1959_v57, 4  ;;  %v1962_v62 = vpop.eup %1455 }
  0xfd   : > { %v769_v6 = vrot.slane %v1962_v62, 4 }
  0xfe   : > { %1457 = vpow2.f32 %v851_v56  ;;  %v764_v5 = vadd.f32 %v1959_v57, %v763_v60 }
  0xff   : > { %1459 = vpow2.f32 %v853_v58  ;;  %v770_v3 = vadd.f32 %v1962_v62, %v769_v6 }
 0x100   : > { %v765_v15 = vrot.slane %v764_v5, 2 }
 0x101   : > { %v771_v25 = vrot.slane %v770_v3, 2 }
 0x102   : > { %v693_v63 = vpop.f32.mrf.mxu0  ;;  %v706_v2 = vpop.f32.mrf.mxu1  ;;  %v766_v24 = vadd.f32 %v765_v15, %v764_v5 }
 0x103   : > { %v785_v1 = vadd.f32 %v783_v59, %v693_v63  ;;  %v786_v7 = vadd.f32 %v784_v61, %v706_v2  ;;  %v772_v34 = vadd.f32 %v771_v25, %v770_v3 }
 0x104   : > { %v1968_v8 = vpop.eup %1457  ;;  %v767_v35 = vrot.slane %v766_v24, 1 }
 0x105   : > { %v1313_v9 = vmul.f32 -1.442695, %v785_v1  ;;  %v1970_v10 = vpop.eup %1459  ;;  %v855_v11 = vrot.slane %v1968_v8, 4  ;;  %v1314_v12 = vmul.f32 -1.442695, %v786_v7  ;;  %v773_v42 = vrot.slane %v772_v34, 1 }
 0x106   : > { %v861_v48 = vrot.slane %v1970_v10, 4  ;;  %v768_v41 = vadd.f32 %v767_v35, %v766_v24 }
 0x107   : > { %1461 = vpow2.f32 %v1313_v9  ;;  %v856_v16 = vadd.f32 %v1968_v8, %v855_v11  ;;  %v774_v53 = vadd.f32 %v773_v42, %v772_v34 }
 0x108   : > { %1463 = vpow2.f32 %v1314_v12  ;;  %v862_v21 = vadd.f32 %v1970_v10, %v861_v48 }
 0x109   : > { %v719_v17 = vpop.f32.mrf.mxu2  ;;  %v857_v28 = vrot.slane %v856_v16, 2 }
 0x10a   : > { %v877_v18 = vadd.f32 %v875_v13, %v719_v17  ;;  %v732_v19 = vpop.f32.mrf.mxu3  ;;  %v695_v20 = vpop.f32.mrf.mxu0  ;;  %v863_v32 = vrot.slane %v862_v21, 2 }
 0x10b   : > { %v878_v22 = vadd.f32 %v876_v14, %v732_v19  ;;  %v708_v23 = vpop.f32.mrf.mxu1  ;;  %v858_v36 = vadd.f32 %v857_v28, %v856_v16 }
 0x10c   : > { %v1315_v26 = vmul.f32 -1.442695, %v877_v18  ;;  %v864_v39 = vadd.f32 %v863_v32, %v862_v21 }
 0x10d   : > { %v1462_v27 = vpop.eup %1461  ;;  %v1316_v29 = vmul.f32 -1.442695, %v878_v22  ;;  %v859_v45 = vrot.slane %v858_v36, 1 }
 0x10e   : > { %v1464_v30 = vpop.eup %1463  ;;  %v793_v31 = vadd.f32 1.0, %v1462_v27  ;;  %1465 = vpow2.f32 %v1315_v26  ;;  %v865_v51 = vrot.slane %v864_v39, 1 }
 0x10f   : > { %v1977_v33 = vadd.f32 1.0, %v1464_v30  ;;  %1467 = vpow2.f32 %v1316_v29  ;;  %v860_v55 = vadd.f32 %v859_v45, %v858_v36 }
 0x110   : > { %1469 = vrcp.f32 %v793_v31  ;;  %v804_v59 = vand.u32 2147483647, %v793_v31  ;;  %v806_v60 = vand.u32 2147483648, %v793_v31  ;;  %v866_v61 = vadd.f32 %v865_v51, %v864_v39 }
 0x111   : > { %1471 = vrcp.f32 %v1977_v33  ;;  %v721_v37 = vpop.f32.mrf.mxu2  ;;  %vm800_vm0 = vweird.f32 %v793_v31  ;;  %v819_v1 = vand.u32 2147483647, %v1977_v33  ;;  %vm815_vm2 = vweird.f32 %v1977_v33 }
 0x112   : > { %v734_v38 = vpop.f32.mrf.mxu3  ;;  %vm2000_vm3 = vcmp.eq.f32.partialorder %v804_v59, 8.507059e+37  ;;  %v807_v9 = vor.u32 1.1754944e-38, %v806_v60  ;;  %v821_v11 = vand.u32 2147483648, %v1977_v33 }
 0x113   : > { %vm2013_vm6 = vcmp.eq.f32.partialorder %v819_v1, 8.507059e+37 }
 0x114   : > { %v1466_v40 = vpop.eup %1465  ;;  %v822_v24 = vor.u32 1.1754944e-38, %v821_v11 }
 0x115   : > { %v1468_v43 = vpop.eup %1467  ;;  %v1980_v44 = vadd.f32 1.0, %v1466_v40 }
 0x116   : > { %v1982_v46 = vpop.eup %1469  ;;  %v1984_v47 = vadd.f32 1.0, %v1468_v43 }
 0x117   : > { %v1986_v49 = vpop.eup %1471  ;;  %v796_v50 = vmul.f32 %v1982_v46, %v793_v31  ;;  %1473 = vrcp.f32 %v1980_v44  ;;  %vm801_vm1 = vweird.f32 %v1982_v46  ;;  %v896_v3 = vand.u32 2147483647, %v1980_v44 }
 0x118   : > { %v811_v52 = vmul.f32 %v1986_v49, %v1977_v33  ;;  %1475 = vrcp.f32 %v768_v41  ;;  %vm816_vm4 = vweird.f32 %v1986_v49  ;;  %vm2009_vm5 = vmor %vm800_vm0, %vm801_vm1  ;;  %v898_v16 = vand.u32 2147483648, %v1980_v44 }
 0x119   : > { %v797_v54 = vsub.f32 1.0, %v796_v50  ;;  %1477 = vrcp.f32 %v1984_v47  ;;  %vm2025_vm8 = vmor %vm815_vm2, %vm816_vm4  ;;  %vm892_vm9 = vweird.f32 %v1980_v44  ;;  %v913_v25 = vand.u32 2147483648, %v1984_v47 }
 0x11a   : > { %v812_v56 = vsub.f32 1.0, %v811_v52  ;;  %1479 = vrcp.f32 %v774_v53  ;;  %v899_v30 = vor.u32 1.1754944e-38, %v898_v16  ;;  %vm907_vm12 = vweird.f32 %v1984_v47 }
 0x11b   : > { %v798_v58 = vmul.f32 %v1982_v46, %v797_v54  ;;  %1481 = vrcp.f32 %v860_v55  ;;  %vm897_vm13 = vcmp.eq.f32.partialorder %v896_v3, 8.507059e+37  ;;  %v914_v36 = vor.u32 1.1754944e-38, %v913_v25 }
 0x11c   : > { %v813_v63 = vmul.f32 %v1986_v49, %v812_v56  ;;  %1483 = vrcp.f32 %v866_v61 }
 0x11d   : > { %v1474_v0 = vpop.eup %1473  ;;  %v799_v4 = vadd.f32 %v1982_v46, %v798_v58 }
 0x11e   : > { %v1476_v2 = vpop.eup %1475  ;;  %v888_v5 = vmul.f32 %v1474_v0, %v1980_v44  ;;  %v814_v12 = vadd.f32 %v1986_v49, %v813_v63  ;;  %vm893_vm7 = vweird.f32 %v1474_v0 }
 0x11f   : > { %v1478_v6 = vpop.eup %1477  ;;  %v777_v17 = vmul.f32 %v1476_v2, %v1959_v57  ;;  %v803_v21 = vsel %vm2009_vm5, %v1982_v46, %v799_v4  ;;  %v911_v57 = vand.u32 2147483647, %v1984_v47  ;;  %vm894_vm11 = vmor %vm892_vm9, %vm893_vm7 }
 0x120   : > { %v889_v13 = vsub.f32 1.0, %v888_v5  ;;  %v903_v48 = vmul.f32 %v1478_v6, %v1984_v47  ;;  %v1480_v18 = vpop.eup %1479  ;;  %vm908_vm10 = vweird.f32 %v1478_v6  ;;  %v818_v28 = vsel %vm2025_vm8, %v1986_v49, %v814_v12 }
 0x121   : > { %v1482_v22 = vpop.eup %1481  ;;  %v778_v31 = vmul.f32 %v1480_v18, %v1962_v62  ;;  %v808_v32 = vsel %vm2000_vm3, %v807_v9, %v803_v21  ;;  %vm909_vm14 = vmor %vm907_vm12, %vm908_vm10  ;;  %vm912_vm15 = vcmp.eq.f32.partialorder %v911_v57, 8.507059e+37  ;;  %v823_v37 = vsel %vm2013_vm6, %v822_v24, %v818_v28 }
 0x122   : > { %v890_v19 = vmul.f32 %v1474_v0, %v889_v13  ;;  %v904_v20 = vsub.f32 1.0, %v903_v48  ;;  %v1484_v29 = vpop.eup %1483  ;;  %v869_v34 = vmul.f32 %v1482_v22, %v1968_v8  ;;  %v825_v39 = vmul.f32 %v808_v32, %v777_v17 }
 0x123   : > { %v870_v62 = vmul.f32 %v1484_v29, %v1970_v10  ;;  %v826_v42 = vmul.f32 %v823_v37, %v778_v31 }
 0x124   : > { %v891_v26 = vadd.f32 %v1474_v0, %v890_v19  ;;  %v905_v27 = vmul.f32 %v1478_v6, %v904_v20 }
 0x126   : > { %v906_v33 = vadd.f32 %v1478_v6, %v905_v27  ;;  %v895_v35 = vsel %vm894_vm11, %v1474_v0, %v891_v26 }
 0x127   : > { %v900_v38 = vsel %vm897_vm13, %v899_v30, %v895_v35 }
 0x128   : > { %v910_v40 = vsel %vm909_vm14, %v1478_v6, %v906_v33  ;;  %v917_v41 = vmul.f32 %v900_v38, %v869_v34 }
 0x129   : > { %v915_v8 = vsel %vm912_vm15, %v914_v36, %v910_v40 }
 0x12a   : > { %v918_v43 = vmul.f32 %v915_v8, %v870_v62  ;;  %v919_v44 = vadd.f32 %v917_v41, %v825_v39 }
 0x12c   : > { %v920_v45 = vadd.f32 %v918_v43, %v826_v42 }
 0x12e   : > { %v921_v46 = vpack.c.bf16 %v920_v45, %v919_v44 }
 0x130   : > { %922 = vst [vmem:[%s242_s17] sm:$0xff] %v921_v46 }
 0x131   : > { %1602 = shalt.err (!%p1599_p5)
}
 0x132   : > { %1397 = dma.vmem_to_hbm [thread:$0]  (%p1755_p11), %s938_s18, 128, %s940_s22, %s924_s26  }
 0x133 PF: > { %s951_s28 = sand.u32 1, %s1633_s12   ;;  %p2097_p7 = scmp.ge.s32.totalorder %s1645_s15, 2 }
 0x134   : > { %s952_s30 = scalar_lea.sflag [#allocation4], %s951_s28 }
 0x135   : > { %p1411_p10 = pnand %p2097_p7, %p1759_p12 }
 0x137   : > { %p1412_p13 = pneg %p1411_p10 }
 0x139   : > { %1628 = dma.done.wait (%p1412_p13), %s952_s30, 128  }
 0x13a   : > { %1630 = vsyncadd (%p1412_p13), %s952_s30, 4294967168  ;;  %p17_p0 = scmp.ge.s32.totalorder %s1691_s16, 4   ;;  %s2098_s12 = smov %s1637_s13 }
 0x13b   : > { %s2099_s13 = smov %s1641_s14  ;;  %s2100_s14 = smov %s1702_s19 }
 0x13c   : > { %s2101_s15 = smov %s1691_s16  ;;  %19 = sbr.rel (!%p17_p0) target bundleno = 8 (0x8), region = 93 }
 0x141   :  { %958 = vsyncpa [#allocation3], 1 }
 0x142   :  { %960 = vsyncpa [#allocation3 + $0x1], 1 }
 0x143   :  { %961 = vsyncpa [#allocation6], 1 }
 0x144   :  { %963 = vsyncpa [#allocation6 + $0x1], 1 }
 0x145   :  { %964 = vsyncpa [#allocation4], 1 }
 0x146   :  { %966 = vsyncpa [#allocation4 + $0x1], 1 }

</bundles_post_ra>
